<compile_context>
chip_gen: v7x
topology: tpu7x:2x2x1
jax: 0.10.0
libtpu: 0.0.40
codegen_flags: <defaults>
</compile_context>

<pallas_src>
import jax
import jax.numpy as jnp
from jax.experimental import pallas as pl
from jax.experimental.pallas import tpu as pltpu


def _cnn_encoder_kernel(x_ref,                      # (1, 2, S, 3E) im2col embeddings, both branches of one batch row
                        w1_ref, b1_ref,             # (3E, H), (1, H)
                        w2_ref, b2_ref,             # (3, H, H), (1, H)
                        wl1_ref, wl2_ref, bl_ref,   # (H, C), (H, C), (1, C)
                        out_ref):                   # (1, 1, C)
    S = x_ref.shape[2]
    H = b1_ref.shape[1]

    # Both branches stacked -> every matmul below is batched over 2*S rows.
    x = x_ref[0]                                    # (2, S, 3E)
    xi = x.reshape(2 * S, x.shape[-1])              # (2S, 3E)

    # conv1 (k=3, pad=1) fused into a single im2col matmul + bias + ReLU.
    h = jnp.maximum(
        jnp.dot(xi, w1_ref[...], preferred_element_type=jnp.float32) + b1_ref[...],
        0.0)                                        # (2S, H)
    h3 = h.reshape(2, S, H)

    # conv2 (k=3, pad=1): zero-pad the sequence as a *value* (no scratch round trip),
    # then three batched shifted matmuls into one f32 accumulator.  The center tap
    # operand is h itself.
    z = jnp.zeros((2, 1, H), jnp.float32)
    hp = jnp.concatenate([z, h3, z], axis=1)        # (2, S+2, H)
    left = hp[:, 0:S, :].reshape(2 * S, H)
    right = hp[:, 2:S + 2, :].reshape(2 * S, H)
    acc = (jnp.dot(left, w2_ref[0], preferred_element_type=jnp.float32)
           + jnp.dot(h, w2_ref[1], preferred_element_type=jnp.float32)
           + jnp.dot(right, w2_ref[2], preferred_element_type=jnp.float32))
    h2 = jnp.maximum(acc + b2_ref[...], 0.0)        # (2S, H)

    # Max-pool over the sequence for both branches at once.
    pooled = jnp.max(h2.reshape(2, S, H), axis=1)   # (2, H)

    # Linear on concat([p1, p2]) == p1 @ Wl[:, :H].T + p2 @ Wl[:, H:].T + bl.
    logits = (jnp.dot(pooled[0:1, :], wl1_ref[...], preferred_element_type=jnp.float32)
              + jnp.dot(pooled[1:2, :], wl2_ref[...], preferred_element_type=jnp.float32)
              + bl_ref[...])                        # (1, C)
    out_ref[0] = logits                             # single full-block store per batch row


def cnn_encoder_forward(x1_ids, x2_ids, params):
    """x1_ids, x2_ids: int32 token ids of shape (B, S)."""
    emb = params['embedding']
    B, S = x1_ids.shape
    E = emb.shape[1]
    H = params['b1'].shape[-1]
    C = params['bl'].shape[-1]

    # Embedding gather + zero-pad + conv1 im2col layout stay in plain JAX (layout glue,
    # tiny at these sizes).  Kept f32 to match the module's .float(); on v6e/v7x bf16
    # embeddings are a drop-in once S*E makes DMA bytes matter.
    # TODO(synk): for large S, move the gather in-kernel via PrefetchScalarGridSpec
    # (token ids as scalar prefetch) and tile S in multiples of 8 through the grid so
    # the working set fits v7x's 64 MiB VMEM; at S=8 everything is a few KiB.
    def im2col(ids):
        e = jnp.take(emb, ids, axis=0).astype(jnp.float32)          # (B, S, E)
        ep = jnp.pad(e, ((0, 0), (1, 1), (0, 0)))                   # (B, S+2, E)
        return jnp.concatenate(
            [ep[:, 0:S, :], ep[:, 1:S + 1, :], ep[:, 2:S + 2, :]], axis=-1)  # (B, S, 3E)

    # (B, 2, S, 3E): batch-major so each grid step grabs both branches of one row.
    x = jnp.stack([im2col(x1_ids), im2col(x2_ids)], axis=1)

    # conv1 weight (3, E, H) -> im2col layout (3E, H): rows = [tap0; tap1; tap2].
    w1cat = params['w1'].reshape(3 * E, H)

    out = pl.pallas_call(
        _cnn_encoder_kernel,
        out_shape=jax.ShapeDtypeStruct((B, 1, C), jnp.float32),
        grid=(B,),
        in_specs=[
            pl.BlockSpec((1, 2, S, 3 * E), lambda b: (b, 0, 0, 0)),
            pl.BlockSpec((3 * E, H), lambda b: (0, 0)),
            pl.BlockSpec((1, H), lambda b: (0, 0)),
            pl.BlockSpec((3, H, H), lambda b: (0, 0, 0)),
            pl.BlockSpec((1, H), lambda b: (0, 0)),
            pl.BlockSpec((H, C), lambda b: (0, 0)),
            pl.BlockSpec((H, C), lambda b: (0, 0)),
            pl.BlockSpec((1, C), lambda b: (0, 0)),
        ],
        out_specs=pl.BlockSpec((1, 1, C), lambda b: (b, 0, 0)),
        compiler_params=pltpu.CompilerParams(
            dimension_semantics=("parallel",)),   # batch rows are independent -> 2 TCs on v7x
    )(x, w1cat, params['b1'], params['w2'], params['b2'],
      params['wl1'], params['wl2'], params['bl'])

    return out.reshape(B, C)


def reference_forward(x1_ids, x2_ids, p):
    """Pure-JAX reference reproducing the PyTorch forward semantics."""
    def conv(x, w, b):  # x (B,S,Cin), w (3,Cin,Cout), b (1,Cout)
        S = x.shape[1]
        xp = jnp.pad(x, ((0, 0), (1, 1), (0, 0)))
        y = sum(jnp.einsum('bse,eh->bsh', xp[:, k:k + S, :], w[k]) for k in range(3))
        return y + b

    def branch(ids):
        e = jnp.take(p['embedding'], ids, axis=0).astype(jnp.float32)
        h = jax.nn.relu(conv(e, p['w1'], p['b1']))
        h = jax.nn.relu(conv(h, p['w2'], p['b2']))
        return jnp.max(h, axis=1)                 # (B, H)

    p1 = branch(x1_ids)
    p2 = branch(x2_ids)
    return p1 @ p['wl1'] + p2 @ p['wl2'] + p['bl']


if __name__ == "__main__":
    V, E, H, C = 50, 16, 32, 4       # vocab, emb_size, hidden_size, num_classes
    B, S = 2, 8                      # batch, sequence length
    key = jax.random.PRNGKey(0)
    ks = jax.random.split(key, 10)

    params = {
        'embedding': jax.random.normal(ks[0], (V, E), jnp.float32),
        # conv1: PyTorch weight (H, E, 3) stored here pre-transposed as (3, E, H)
        'w1': 0.1 * jax.random.normal(ks[1], (3, E, H), jnp.float32),
        'b1': 0.1 * jax.random.normal(ks[2], (1, H), jnp.float32),
        # conv2: (3, H, H)
        'w2': 0.1 * jax.random.normal(ks[3], (3, H, H), jnp.float32),
        'b2': 0.1 * jax.random.normal(ks[4], (1, H), jnp.float32),
        # linear: PyTorch weight (C, 2H) split into the x1 half and x2 half,
        # each stored transposed as (H, C)
        'wl1': 0.1 * jax.random.normal(ks[5], (H, C), jnp.float32),
        'wl2': 0.1 * jax.random.normal(ks[6], (H, C), jnp.float32),
        'bl': 0.1 * jax.random.normal(ks[7], (1, C), jnp.float32),
    }

    x1 = jax.random.randint(ks[8], (B, S), 0, V, dtype=jnp.int32)
    x2 = jax.random.randint(ks[9], (B, S), 0, V, dtype=jnp.int32)

    out = cnn_encoder_forward(x1, x2, params)
    jax.block_until_ready(out)

    ref = reference_forward(x1, x2, params)
    assert out.shape == (B, C), out.shape
    assert jnp.allclose(out, ref, atol=1e-4, rtol=1e-4), (out, ref)
    print("KERNEL_OK")
</pallas_src>

<mosaic_0001>
module attributes {stable_mosaic.version = 11 : i64} {
  func.func @_cnn_encoder_kernel(%arg0: i32, %arg1: memref<1x2x8x48xf32, #tpu.memory_space<vmem>>, %arg2: memref<48x32xf32, #tpu.memory_space<vmem>>, %arg3: memref<1x32xf32, #tpu.memory_space<vmem>>, %arg4: memref<3x32x32xf32, #tpu.memory_space<vmem>>, %arg5: memref<1x32xf32, #tpu.memory_space<vmem>>, %arg6: memref<32x4xf32, #tpu.memory_space<vmem>>, %arg7: memref<32x4xf32, #tpu.memory_space<vmem>>, %arg8: memref<1x4xf32, #tpu.memory_space<vmem>>, %arg9: memref<1x1x4xf32, #tpu.memory_space<vmem>>) attributes {dimension_semantics = [#tpu.dimension_semantics<parallel>], iteration_bounds = array<i64: 2>, scalar_prefetch = 0 : i64, scratch_operands = 0 : i64, tpu.core_type = #tpu.core_type<tc>, window_params = [{transform_indices = @transform_0, window_bounds = array<i64: 1, 2, 8, 48>}, {pipeline_mode = #tpu.pipeline_mode<synchronous>, transform_indices = @transform_1, window_bounds = array<i64: 48, 32>}, {pipeline_mode = #tpu.pipeline_mode<synchronous>, transform_indices = @transform_2, window_bounds = array<i64: 1, 32>}, {pipeline_mode = #tpu.pipeline_mode<synchronous>, transform_indices = @transform_3, window_bounds = array<i64: 3, 32, 32>}, {pipeline_mode = #tpu.pipeline_mode<synchronous>, transform_indices = @transform_4, window_bounds = array<i64: 1, 32>}, {pipeline_mode = #tpu.pipeline_mode<synchronous>, transform_indices = @transform_5, window_bounds = array<i64: 32, 4>}, {pipeline_mode = #tpu.pipeline_mode<synchronous>, transform_indices = @transform_6, window_bounds = array<i64: 32, 4>}, {pipeline_mode = #tpu.pipeline_mode<synchronous>, transform_indices = @transform_7, window_bounds = array<i64: 1, 4>}, {transform_indices = @transform_8, window_bounds = array<i64: 1, 1, 4>}]} {
    %c0 = arith.constant 0 : index
    %c0_0 = arith.constant 0 : index
    %c0_1 = arith.constant 0 : index
    %c0_2 = arith.constant 0 : index
    %0 = vector.load %arg1[%c0, %c0_0, %c0_1, %c0_2] : memref<1x2x8x48xf32, #tpu.memory_space<vmem>>, vector<1x2x8x48xf32>
    %1 = vector.shape_cast %0 : vector<1x2x8x48xf32> to vector<2x8x48xf32>
    %2 = vector.shape_cast %1 : vector<2x8x48xf32> to vector<16x48xf32>
    %c0_3 = arith.constant 0 : index
    %c0_4 = arith.constant 0 : index
    %3 = vector.load %arg2[%c0_3, %c0_4] : memref<48x32xf32, #tpu.memory_space<vmem>>, vector<48x32xf32>
    %cst = arith.constant dense<0.000000e+00> : vector<16x32xf32>
    %4 = tpu.matmul %2, %3, %cst {dimension_numbers = #tpu.dot_dimension_numbers<[1], [0], [0], [1], [0, 0, 1, 1], [], []>} : vector<16x48xf32>, vector<48x32xf32>, vector<16x32xf32> -> vector<16x32xf32>
    %c0_5 = arith.constant 0 : index
    %c0_6 = arith.constant 0 : index
    %5 = vector.load %arg3[%c0_5, %c0_6] : memref<1x32xf32, #tpu.memory_space<vmem>>, vector<1x32xf32>
    %6 = vector.broadcast %5 : vector<1x32xf32> to vector<16x32xf32>
    %7 = arith.addf %4, %6 : vector<16x32xf32>
    %cst_7 = arith.constant 0.000000e+00 : f32
    %8 = vector.broadcast %cst_7 : f32 to vector<16x32xf32>
    %9 = arith.maximumf %7, %8 : vector<16x32xf32>
    %10 = vector.shape_cast %9 : vector<16x32xf32> to vector<2x8x32xf32>
    %cst_8 = arith.constant 0.000000e+00 : f32
    %11 = vector.broadcast %cst_8 : f32 to vector<2x1x32xf32>
    %12 = tpu.concatenate %11, %10, %11 in 1 : vector<2x1x32xf32>, vector<2x8x32xf32>, vector<2x1x32xf32> -> vector<2x10x32xf32>
    %13 = vector.extract_strided_slice %12 {offsets = [0, 0, 0], sizes = [2, 8, 32], strides = [1, 1, 1]} : vector<2x10x32xf32> to vector<2x8x32xf32>
    %14 = vector.shape_cast %13 : vector<2x8x32xf32> to vector<16x32xf32>
    %15 = vector.extract_strided_slice %12 {offsets = [0, 2, 0], sizes = [2, 8, 32], strides = [1, 1, 1]} : vector<2x10x32xf32> to vector<2x8x32xf32>
    %16 = vector.shape_cast %15 : vector<2x8x32xf32> to vector<16x32xf32>
    %c0_9 = arith.constant 0 : index
    %c0_10 = arith.constant 0 : index
    %c0_11 = arith.constant 0 : index
    %17 = vector.load %arg4[%c0_9, %c0_10, %c0_11] : memref<3x32x32xf32, #tpu.memory_space<vmem>>, vector<1x32x32xf32>
    %18 = vector.shape_cast %17 : vector<1x32x32xf32> to vector<32x32xf32>
    %cst_12 = arith.constant dense<0.000000e+00> : vector<16x32xf32>
    %19 = tpu.matmul %14, %18, %cst_12 {dimension_numbers = #tpu.dot_dimension_numbers<[1], [0], [0], [1], [0, 0, 1, 1], [], []>} : vector<16x32xf32>, vector<32x32xf32>, vector<16x32xf32> -> vector<16x32xf32>
    %c1 = arith.constant 1 : index
    %c0_13 = arith.constant 0 : index
    %c0_14 = arith.constant 0 : index
    %20 = vector.load %arg4[%c1, %c0_13, %c0_14] : memref<3x32x32xf32, #tpu.memory_space<vmem>>, vector<1x32x32xf32>
    %21 = vector.shape_cast %20 : vector<1x32x32xf32> to vector<32x32xf32>
    %cst_15 = arith.constant dense<0.000000e+00> : vector<16x32xf32>
    %22 = tpu.matmul %9, %21, %cst_15 {dimension_numbers = #tpu.dot_dimension_numbers<[1], [0], [0], [1], [0, 0, 1, 1], [], []>} : vector<16x32xf32>, vector<32x32xf32>, vector<16x32xf32> -> vector<16x32xf32>
    %23 = arith.addf %19, %22 : vector<16x32xf32>
    %c2 = arith.constant 2 : index
    %c0_16 = arith.constant 0 : index
    %c0_17 = arith.constant 0 : index
    %24 = vector.load %arg4[%c2, %c0_16, %c0_17] : memref<3x32x32xf32, #tpu.memory_space<vmem>>, vector<1x32x32xf32>
    %25 = vector.shape_cast %24 : vector<1x32x32xf32> to vector<32x32xf32>
    %cst_18 = arith.constant dense<0.000000e+00> : vector<16x32xf32>
    %26 = tpu.matmul %16, %25, %cst_18 {dimension_numbers = #tpu.dot_dimension_numbers<[1], [0], [0], [1], [0, 0, 1, 1], [], []>} : vector<16x32xf32>, vector<32x32xf32>, vector<16x32xf32> -> vector<16x32xf32>
    %27 = arith.addf %23, %26 : vector<16x32xf32>
    %c0_19 = arith.constant 0 : index
    %c0_20 = arith.constant 0 : index
    %28 = vector.load %arg5[%c0_19, %c0_20] : memref<1x32xf32, #tpu.memory_space<vmem>>, vector<1x32xf32>
    %29 = vector.broadcast %28 : vector<1x32xf32> to vector<16x32xf32>
    %30 = arith.addf %27, %29 : vector<16x32xf32>
    %cst_21 = arith.constant 0.000000e+00 : f32
    %31 = vector.broadcast %cst_21 : f32 to vector<16x32xf32>
    %32 = arith.maximumf %30, %31 : vector<16x32xf32>
    %33 = vector.shape_cast %32 : vector<16x32xf32> to vector<2x8x32xf32>
    %cst_22 = arith.constant dense<0xFF800000> : vector<2x32xf32>
    %34 = vector.multi_reduction <maximumf>, %33, %cst_22 [1] : vector<2x8x32xf32> to vector<2x32xf32>
    %35 = vector.extract_strided_slice %34 {offsets = [0, 0], sizes = [1, 32], strides = [1, 1]} : vector<2x32xf32> to vector<1x32xf32>
    %c0_23 = arith.constant 0 : index
    %c0_24 = arith.constant 0 : index
    %36 = vector.load %arg6[%c0_23, %c0_24] : memref<32x4xf32, #tpu.memory_space<vmem>>, vector<32x4xf32>
    %cst_25 = arith.constant dense<0.000000e+00> : vector<1x4xf32>
    %37 = tpu.matmul %35, %36, %cst_25 {dimension_numbers = #tpu.dot_dimension_numbers<[1], [0], [0], [1], [0, 0, 1, 1], [], []>} : vector<1x32xf32>, vector<32x4xf32>, vector<1x4xf32> -> vector<1x4xf32>
    %38 = vector.extract_strided_slice %34 {offsets = [1, 0], sizes = [1, 32], strides = [1, 1]} : vector<2x32xf32> to vector<1x32xf32>
    %c0_26 = arith.constant 0 : index
    %c0_27 = arith.constant 0 : index
    %39 = vector.load %arg7[%c0_26, %c0_27] : memref<32x4xf32, #tpu.memory_space<vmem>>, vector<32x4xf32>
    %cst_28 = arith.constant dense<0.000000e+00> : vector<1x4xf32>
    %40 = tpu.matmul %38, %39, %cst_28 {dimension_numbers = #tpu.dot_dimension_numbers<[1], [0], [0], [1], [0, 0, 1, 1], [], []>} : vector<1x32xf32>, vector<32x4xf32>, vector<1x4xf32> -> vector<1x4xf32>
    %41 = arith.addf %37, %40 : vector<1x4xf32>
    %c0_29 = arith.constant 0 : index
    %c0_30 = arith.constant 0 : index
    %42 = vector.load %arg8[%c0_29, %c0_30] : memref<1x4xf32, #tpu.memory_space<vmem>>, vector<1x4xf32>
    %43 = arith.addf %41, %42 : vector<1x4xf32>
    %c0_31 = arith.constant 0 : index
    %c0_32 = arith.constant 0 : index
    %c0_33 = arith.constant 0 : index
    %44 = vector.load %arg9[%c0_31, %c0_32, %c0_33] : memref<1x1x4xf32, #tpu.memory_space<vmem>>, vector<1x1x4xf32>
    %45 = vector.shape_cast %44 : vector<1x1x4xf32> to vector<1x4xf32>
    %46 = vector.shape_cast %43 : vector<1x4xf32> to vector<1x1x4xf32>
    tpu.vector_store %arg9[%c0_31, %c0_32, %c0_33], %46 {strides = array<i32>} : memref<1x1x4xf32, #tpu.memory_space<vmem>>, vector<1x1x4xf32>,
    return
  }
  func.func @transform_0(%arg0: i32) -> (i32, i32, i32, i32) {
    %c0_i32 = arith.constant 0 : i32
    %c0_i32_0 = arith.constant 0 : i32
    %c0_i32_1 = arith.constant 0 : i32
    %c0_i32_2 = arith.constant 0 : i32
    return %arg0, %c0_i32, %c0_i32_0, %c0_i32_1 : i32, i32, i32, i32
  }
  func.func @transform_1(%arg0: i32) -> (i32, i32) {
    %c0_i32 = arith.constant 0 : i32
    %c0_i32_0 = arith.constant 0 : i32
    %c0_i32_1 = arith.constant 0 : i32
    return %c0_i32, %c0_i32_0 : i32, i32
  }
  func.func @transform_2(%arg0: i32) -> (i32, i32) {
    %c0_i32 = arith.constant 0 : i32
    %c0_i32_0 = arith.constant 0 : i32
    %c0_i32_1 = arith.constant 0 : i32
    return %c0_i32, %c0_i32_0 : i32, i32
  }
  func.func @transform_3(%arg0: i32) -> (i32, i32, i32) {
    %c0_i32 = arith.constant 0 : i32
    %c0_i32_0 = arith.constant 0 : i32
    %c0_i32_1 = arith.constant 0 : i32
    %c0_i32_2 = arith.constant 0 : i32
    return %c0_i32, %c0_i32_0, %c0_i32_1 : i32, i32, i32
  }
  func.func @transform_4(%arg0: i32) -> (i32, i32) {
    %c0_i32 = arith.constant 0 : i32
    %c0_i32_0 = arith.constant 0 : i32
    %c0_i32_1 = arith.constant 0 : i32
    return %c0_i32, %c0_i32_0 : i32, i32
  }
  func.func @transform_5(%arg0: i32) -> (i32, i32) {
    %c0_i32 = arith.constant 0 : i32
    %c0_i32_0 = arith.constant 0 : i32
    %c0_i32_1 = arith.constant 0 : i32
    return %c0_i32, %c0_i32_0 : i32, i32
  }
  func.func @transform_6(%arg0: i32) -> (i32, i32) {
    %c0_i32 = arith.constant 0 : i32
    %c0_i32_0 = arith.constant 0 : i32
    %c0_i32_1 = arith.constant 0 : i32
    return %c0_i32, %c0_i32_0 : i32, i32
  }
  func.func @transform_7(%arg0: i32) -> (i32, i32) {
    %c0_i32 = arith.constant 0 : i32
    %c0_i32_0 = arith.constant 0 : i32
    %c0_i32_1 = arith.constant 0 : i32
    return %c0_i32, %c0_i32_0 : i32, i32
  }
  func.func @transform_8(%arg0: i32) -> (i32, i32, i32) {
    %c0_i32 = arith.constant 0 : i32
    %c0_i32_0 = arith.constant 0 : i32
    %c0_i32_1 = arith.constant 0 : i32
    return %arg0, %c0_i32, %c0_i32_0 : i32, i32, i32
  }
}

</mosaic_0001>

<bundles_post_ra>
// kernel: tpu_custom_call.1
= control target key start
LH: loop header
LB: loop body
LE: loop exit
PB: predicated region body
PF: predicated region fallthrough
CT: control target
= control target key end

     0   :  { %13 = vsyncpa [#allocation3], 0  ;;  %s1475_s0 = inlined_call_operand.vmem [shape: f32[2,2,8,48], index: 0, kind: input, shape index: {}]   ;;  %s1476_s1 = inlined_call_operand.vmem [shape: f32[48,32], index: 1, kind: input, shape index: {}]   ;;  %s1477_s2 = inlined_call_operand.vmem [shape: f32[1,32], index: 2, kind: input, shape index: {}]   ;;  %s1478_s3 = inlined_call_operand.vmem [shape: f32[3,32,32], index: 3, kind: input, shape index: {}]   ;;  %s1479_s4 = inlined_call_operand.vmem [shape: f32[1,32], index: 4, kind: input, shape index: {}]   ;;  %s1480_s5 = inlined_call_operand.vmem [shape: f32[32,4], index: 5, kind: input, shape index: {}]   ;;  %s1481_s6 = inlined_call_operand.vmem [shape: f32[32,4], index: 6, kind: input, shape index: {}]   ;;  %s1482_s7 = inlined_call_operand.vmem [shape: f32[1,4], index: 7, kind: input, shape index: {}]   ;;  %s1483_s8 = inlined_call_operand.hbm [shape: f32[2,1,4], index: 8, kind: output, shape index: {}]  }
   0x1   :  { %15 = vsyncpa [#allocation3 + $0x1], 0  ;;  %s1272_s27 = smov 0   ;;  %s1274_s28 = smov 0  }
   0x2   :  { %s1276_s29 = smov 0   ;;  %s1278_s30 = smov 0  }
   0x3 LB: > { %s1293_s9 = sadd.s32 4294967295, %s1221_s30   ;;  %s929_s10 = sadd.s32 4294967294, %s1221_s30   ;;  %s1221_s30 = sphi %s1278_s30, %s1489_s30   ;;  %s1217_s29 = sphi %s1276_s29, %s1488_s29   ;;  %s1213_s28 = sphi %s1274_s28, %s1487_s28   ;;  %s1209_s27 = sphi %s1272_s27, %s1486_s27  }
   0x4   : > { %s1297_s11 = sadd.s32 1, %s1221_s30   ;;  %s201_s12 = sadd.s32 1, %s1217_s29 }
   0x5   : > { %s198_s13 = ssub.s32 %s1221_s30, %s1297_s11  ;;  %p211_p0 = scmp.ne.s32.totalorder %s1217_s29, %s1213_s28 }
   0x6   : > { %p199_p1 = scmp.eq.s32.totalorder %s198_s13, 0  ;;  %p212_p2 = scmp.eq.s32.totalorder %s1293_s9, 1 }
   0x7   : > { %p217_p3 = scmp.ne.s32.totalorder %s1213_s28, %s1209_s27  ;;  %p218_p4 = scmp.eq.s32.totalorder %s929_s10, 1 }
   0x8   : > { %s1308_s14 = scalar_select %p199_p1, %s1217_s29, %s201_s12  }
   0x9   : > { %p1310_p5 = por %p212_p2, %p211_p0  ;;  %p1314_p6 = por %p218_p4, %p217_p3 }
   0xa   : > { %p932_p7 = scmp.ge.s32.totalorder %s1221_s30, 1  ;;  %p265_p8 = scmp.lt.s32.totalorder %s1221_s30, 3 }
   0xc   : > { %p266_p9 = pnand %p932_p7, %p265_p8 }
   0xd   : > { %v305_v0 = vld [vmem:[%s1476_s1] sm:$0xff] (!%p266_p9)  ;;  %v306_v1 = vld [vmem:[%s1476_s1 + $0x8] sm:$0xff] (!%p266_p9)  ;;  %v307_v2 = vld [vmem:[%s1476_s1 + $0x10] sm:$0xff] (!%p266_p9)  ;;  %p298_p10 = scmp.lt.s32.totalorder (!%p266_p9), %s1293_s9, 1  ;;  %vm318_vm0 = vcmask (!%p266_p9), 392192   ;;  %vm433_vm1 = vcmask (!%p266_p9), 261120  }
   0xe   : > { %269 = sbr.rel (%p266_p9) target bundleno = 729 (0x2d9), region = 52  ;;  %v1065_v3 = vpack.c.bf16 (!%p266_p9), %v306_v1, %v305_v0  ;;  %v308_v4 = vld [vmem:[%s1476_s1 + $0x18] sm:$0xff] (!%p266_p9)  ;;  %v309_v5 = vld [vmem:[%s1476_s1 + $0x20] sm:$0xff] (!%p266_p9)  ;;  %v310_v7 = vld [vmem:[%s1476_s1 + $0x28] sm:$0xff] (!%p266_p9)  ;;  %vm408_vm2 = vcmask (!%p266_p9), 1040384   ;;  %vm417_vm3 = vcmask (!%p266_p9), 1045504  }
   0xf   : > { %v1069_v6 = vpack.c.bf16 (!%p266_p9), %v308_v4, %v307_v2  ;;  %v938_v8 = vld [vmem:[%s1478_s3 + $0x20] sm:$0xff] (!%p266_p9)  ;;  %v939_v9 = vld [vmem:[%s1478_s3 + $0x28] sm:$0xff] (!%p266_p9)  ;;  %v1073_v11 = vpack.c.bf16 (!%p266_p9), %v310_v7, %v309_v5  ;;  %v940_v14 = vld [vmem:[%s1478_s3 + $0x30] sm:$0xff] (!%p266_p9)  ;;  %v1223_v51 = vmov (!%p266_p9), 0.0|0.0   ;;  %vm1224_vm4 = vmmov (!%p266_p9), 0   ;;  %s296_s26 = sand.u32 (!%p266_p9), 1, %s1213_s28  }
  0x10   : > { %1066 = vmatprep.subr.bf16.mxu0 (!%p266_p9), %v1065_v3  ;;  %v1077_v10 = vpack.c.bf16 (!%p266_p9), %v939_v9, %v938_v8  ;;  %v941_v15 = vld [vmem:[%s1478_s3 + $0x38] sm:$0xff] (!%p266_p9)  ;;  %v424_v17 = vld [vmem:[%s1478_s3] sm:$0xff] (!%p266_p9)  ;;  %v425_v18 = vld [vmem:[%s1478_s3 + $0x8] sm:$0xff] (!%p266_p9)  ;;  %v1225_v55 = vmov (!%p266_p9), 0.0   ;;  %s297_s17 = scalar_lea.vmem (!%p266_p9), [#allocation2], %s296_s26  ;;  %vm859_vm5 = vcmask (!%p266_p9), 24576  }
  0x11   : > { %1068 = vmatpush3.bf16.msra.mxu0 (!%p266_p9), %v1065_v3  ;;  %v1081_v16 = vpack.c.bf16 (!%p266_p9), %v941_v15, %v940_v14  ;;  %v1085_v19 = vpack.c.bf16 (!%p266_p9), %v425_v18, %v424_v17  ;;  %v935_v20 = vld [vmem:[%s1477_s2] ss:$0 sm:$0xff] (!%p266_p9)  ;;  %v426_v25 = vld [vmem:[%s1478_s3 + $0x10] sm:$0xff] (!%p266_p9)  ;;  %v427_v26 = vld [vmem:[%s1478_s3 + $0x18] sm:$0xff] (!%p266_p9)  ;;  %s874_s18 = sshll.u32 (!%p266_p9), %s297_s17, 4  ;;  %s862_s22 = scalar_lea.sflag (!%p266_p9), [#allocation3], %s296_s26  ;;  %s1435_s18 = int_to_ptr.vmem [resolvable:$true] %s874_s18 }
  0x12   : > { %1070 = vmatprep.subr.bf16.mxu0 (!%p266_p9), %v1069_v6  ;;  %1078 = vmatprep.subr.bf16.mxu1 (!%p266_p9), %v1077_v10  ;;  %v1089_v29 = vpack.c.bf16 (!%p266_p9), %v427_v26, %v426_v25  ;;  %v946_v31 = vld [vmem:[%s1478_s3 + $0x40] sm:$0xff] (!%p266_p9)  ;;  %v947_v32 = vld [vmem:[%s1478_s3 + $0x48] sm:$0xff] (!%p266_p9)  ;;  %v948_v37 = vld [vmem:[%s1478_s3 + $0x50] sm:$0xff] (!%p266_p9)  ;;  %s1159_s23 = scalar_lea.vmem (!%p266_p9), %s1435_s18, 16 }
  0x13   : > { %1080 = vmatpush3.bf16.msra.mxu1 (!%p266_p9), %v1077_v10  ;;  %v1093_v35 = vpack.c.bf16 (!%p266_p9), %v947_v32, %v946_v31  ;;  %v949_v38 = vld [vmem:[%s1478_s3 + $0x58] sm:$0xff] (!%p266_p9)  ;;  %v707_v48 = vld [vmem:[%s1481_s6] sm:$0xff] (!%p266_p9)  ;;  %v708_v49 = vld [vmem:[%s1481_s6 + $0x8] sm:$0xff] (!%p266_p9)  ;;  %p1160_p11 = scmp.ne.s32.totalorder (!%p266_p9), %s1435_s18, %s1159_s23 }
  0x14   : > { %1082 = vmatprep.subr.bf16.mxu1 (!%p266_p9), %v1081_v16  ;;  %v1097_v41 = vpack.c.bf16 (!%p266_p9), %v949_v38, %v948_v37  ;;  %v1102_v50 = vpack.c.bf16 (!%p266_p9), %v708_v49, %v707_v48  ;;  %v709_v52 = vld [vmem:[%s1481_s6 + $0x10] sm:$0xff] (!%p266_p9)  ;;  %v710_v53 = vld [vmem:[%s1481_s6 + $0x18] sm:$0xff] (!%p266_p9)  ;;  %v952_v56 = vld [vmem:[%s1479_s4] ss:$0 sm:$0xff] (!%p266_p9) }
  0x15   : > { %s299_s13 = scalar_select %p298_p10, %s1293_s9, 1  ;;  %1072 = vmatpush3.bf16.msra.mxu0 %v1069_v6  ;;  %v1105_v54 = vpack.c.bf16 %v710_v53, %v709_v52  ;;  %v703_v8 = vld [vmem:[%s1480_s5] sm:$0xff]  ;;  %v704_v9 = vld [vmem:[%s1480_s5 + $0x8] sm:$0xff]  ;;  %v705_v14 = vld [vmem:[%s1480_s5 + $0x10] sm:$0xff] }
  0x16   : > { %1074 = vmatprep.subr.bf16.mxu0 %v1073_v11  ;;  %v706_v15 = vld [vmem:[%s1480_s5 + $0x18] sm:$0xff]  ;;  %p1161_p12 = pnand %p1160_p11, %p1310_p5 }
  0x17   : > { %s958_s21 = sshll.u32 %s299_s13, 4  ;;  %1084 = vmatpush3.bf16.msra.mxu1 %v1081_v16  ;;  %v1111_v16 = vpack.c.bf16 %v706_v15, %v705_v14  ;;  %s955_s13 = sshll.u32 %s1293_s9, 4 }
  0x18   : > { %s302_s24 = scalar_lea.vmem %s1475_s0, %s958_s21  ;;  %1086 = vmatprep.subr.bf16.mxu1 %v1085_v19  ;;  %s1433_s21 = scalar_lea.hbm %s1483_s8, %s955_s13 }
  0x19   : > { %v303_v12 = vld [vmem:[%s302_s24] sm:$0xff]  ;;  %1076 = vmatpush3.bf16.msra.mxu0 %v1073_v11  ;;  %v304_v13 = vld [vmem:[%s302_s24 + $0x8] sm:$0xff]  ;;  %v1108_v11 = vpack.c.bf16 %v704_v9, %v703_v8  ;;  %p1162_p13 = pneg %p1161_p12  ;;  %s1226_s9 = smov [#allocation2]  }
  0x1a   : > { %1007 = vmatprep.mubr.msk.f32.mxu0 %vm318_vm0, %v303_v12  ;;  %1101 = vmatprep.subr.bf16.mxu0 %v1223_v51  ;;  %s1163_s24 = sshll.u32 %s1226_s9, 4  ;;  %s1164_s24 = int_to_ptr.vmem [resolvable:$false] %s1163_s24 }
  0x1b   : > { %s1165_s25 = scalar_lea.vmem %s1164_s24, 32  ;;  %p1166_p0 = scmp.lt.s32.totalorder %s1435_s18, %s1164_s24 }
  0x1c   : > { %1008 = vmatmul.mubr.msk.f32.vlgmr.msra.gmra.mrb[0].mxu0 %vm318_vm0, %v304_v13  ;;  %p1167_p1 = scmp.lt.s32.totalorder %s1165_s25, %s1159_s23 }
  0x1d   : > { %1103 = vmatpush3.bf16.msra.mxu0 %v1102_v50  ;;  %1051 = vmatprep.mubr.msk.f32.mxu0 %vm1224_vm4, %v1225_v55 }
  0x1e   : > { %1104 = vmatprep.subr.bf16.mxu0 %v1223_v51  ;;  %p1168_p2 = por %p1167_p1, %p1166_p0 }
  0x20   : > { %p1169_p3 = pnand %p1168_p2, %p1162_p13 }
  0x21   : > { %1106 = vmatpush3.bf16.msra.mxu0 %v1105_v54 }
  0x22   : > { %1107 = vmatprep.subr.bf16.mxu0 %v1223_v51 }
  0xef   : > { %v1009_v21 = vpop.f32.mrb[0].mxu0 }
  0xf0   : > { %v397_v22 = vadd.f32 %v1009_v21, %v935_v20  ;;  %v391_v23 = vpop.f32.mrb[1].mxu0 }
  0xf1   : > { %v392_v24 = vadd.f32 %v935_v20, %v391_v23 }
  0xf2   : > { %v401_v28 = vmax.f32 %v397_v22, 0.0  ;;  %v857_v22 = vld [vmem:[%s1482_s7] sm:$0x1] }
  0xf3   : > { %v400_v27 = vmax.f32 %v392_v24, 0.0 }
  0xf4   : > { %v405_v36 = vrot.slane %v401_v28, 7 }
  0xf5   : > { %v404_v30 = vrot.slane %v400_v27, 7  ;;  %1018 = vmatprep.mubr.msk.f32.mxu1 %vm433_vm1, %v400_v27 }
  0xf6   : > { %1019 = vmatmul.mubr.msk.f32.vlgmr.msra.gmra.mrb[0].mxu1 %vm433_vm1, %v401_v28  ;;  %v410_v42 = vsel %vm408_vm2, 0.0, %v405_v36  ;;  %v412_v43 = vsel %vm408_vm2, %v405_v36, 0.0 }
  0xf7   : > { %v411_v33 = vsel %vm408_vm2, %v404_v30, 0.0  ;;  %1088 = vmatpush3.bf16.msra.mxu1 %v1085_v19  ;;  %v409_v34 = vsel %vm408_vm2, 0.0, %v404_v30  ;;  %v421_v45 = vrot.slane %v410_v42, 2  ;;  %v422_v46 = vrot.slane %v412_v43, 2 }
  0xf8   : > { %1029 = vmatprep.mubr.msk.f32.mxu1 %vm433_vm1, %v409_v34  ;;  %1090 = vmatprep.subr.bf16.mxu1 %v1089_v29  ;;  %v419_v39 = vrot.slane %v411_v33, 2  ;;  %v418_v40 = vrot.slane %v409_v34, 2 }
  0xf9   : > { %v423_v47 = vsel %vm417_vm3, %v421_v45, %v422_v46 }
  0xfa   : > { %v420_v44 = vsel %vm417_vm3, %v418_v40, %v419_v39 }
  0xfb   : > { %1092 = vmatpush3.bf16.msra.mxu1 %v1089_v29 }
  0xfc   : > { %1094 = vmatprep.subr.bf16.mxu1 %v1093_v35 }
  0xfe   : > { %1030 = vmatmul.mubr.msk.f32.vlgmr.msra.gmra.mrb[0].mxu1 %vm433_vm1, %v410_v42 }
  0xff   : > { %1096 = vmatpush3.bf16.msra.mxu1 %v1093_v35  ;;  %1040 = vmatprep.mubr.msk.f32.mxu1 %vm433_vm1, %v420_v44 }
 0x100   : > { %1098 = vmatprep.subr.bf16.mxu1 %v1097_v41 }
 0x103   : > { %1100 = vmatpush3.bf16.msra.mxu1 %v1097_v41 }
 0x106   : > { %1041 = vmatmul.mubr.msk.f32.vlgmr.msra.gmra.mrb[0].mxu1 %vm433_vm1, %v423_v47 }
 0x1d9   : > { %v1042_v57 = vpop.f32.mrb[0].mxu1 }
 0x1da   : > { %v686_v58 = vadd.f32 %v1042_v57, %v952_v56  ;;  %v667_v59 = vpop.f32.mrb[1].mxu1 }
 0x1db   : > { %v685_v60 = vadd.f32 %v952_v56, %v667_v59 }
 0x1dc   : > { %v688_v61 = vmax.f32 %v686_v58, 0.0 }
 0x1dd   : > { %v687_v62 = vmax.f32 %v685_v60, 0.0 }
 0x1de   : > { %v696_v63 = vsel %vm433_vm1, %v688_v61, -inf }
 0x1df   : > { %v697_v0 = vrot.slane %v696_v63, 4  ;;  %v689_v1 = vsel %vm433_vm1, %v687_v62, -inf }
 0x1e0   : > { %v690_v2 = vrot.slane %v689_v1, 4 }
 0x1e1   : > { %v698_v3 = vmax.f32 %v696_v63, %v697_v0 }
 0x1e2   : > { %v691_v4 = vmax.f32 %v689_v1, %v690_v2 }
 0x1e3   : > { %v699_v5 = vrot.slane %v698_v3, 2 }
 0x1e4   : > { %v692_v7 = vrot.slane %v691_v4, 2 }
 0x1e5   : > { %v700_v6 = vmax.f32 %v698_v3, %v699_v5 }
 0x1e6   : > { %v693_v13 = vmax.f32 %v691_v4, %v692_v7 }
 0x1e7   : > { %v701_v10 = vrot.slane %v700_v6, 1 }
 0x1e8   : > { %v694_v17 = vrot.slane %v693_v13, 1 }
 0x1e9   : > { %v702_v12 = vmax.f32 %v700_v6, %v701_v10 }
 0x1ea   : > { %v695_v18 = vmax.f32 %v693_v13, %v694_v17 }
 0x1eb   : > { %1052 = vmatmul.mubr.msk.f32.vlgmr.msra.gmra.mrb[2].mxu0 %vm433_vm1, %v702_v12 }
 0x1ec   : > { %1109 = vmatpush3.bf16.msra.mxu0 %v1108_v11  ;;  %1062 = vmatprep.mubr.msk.f32.mxu0 %vm1224_vm4, %v1225_v55 }
 0x1ed   : > { %1110 = vmatprep.subr.bf16.mxu0 %v1223_v51 }
 0x1f0   : > { %1112 = vmatpush3.bf16.msra.mxu0 %v1111_v16 }
 0x1f3   : > { %1063 = vmatmul.mubr.msk.f32.vlgmr.msra.gmra.mrb[4].mxu0 %vm433_vm1, %v695_v18 }
 0x2be   : > { %v780_v19 = vpop.f32.mrb[2].mxu0 }
 0x2bf   : > { %v1053_v20 = vpop.f32.mrb[3].mxu0 }
 0x2c6   : > { %v853_v21 = vpop.f32.mrb[4].mxu0 }
 0x2c7   : > { %v854_v23 = vadd.f32 %v853_v21, %v780_v19  ;;  %v1064_v24 = vpop.f32.mrb[5].mxu0 }
 0x2c9   : > { %v858_v25 = vadd.f32 %v857_v22, %v854_v23 }
 0x2cb   : > { %860 = vst.msk [vmem:[%s297_s17] sm:$0x1] %vm859_vm5, %v858_v25 }
 0x2cc   : > { %1172 = shalt.err (!%p1169_p3)
}
 0x2cd   : > { %s1173_s26 = scalar_lea.hbm %s1433_s21, 16  ;;  %s1177_s13 = scalar_lea.hbm %s1483_s8, 32 }
 0x2ce   : > { %p1174_p4 = scmp.ne.s32.totalorder %s1433_s21, %s1173_s26  ;;  %p1178_p9 = scmp.lt.u32.totalorder %s1433_s21, %s1483_s8 }
 0x2cf   : > { %p1179_p10 = scmp.lt.u32.totalorder %s1177_s13, %s1173_s26  ;;  %p1181_p12 = scmp.lt.u32.totalorder %s1173_s26, %s1433_s21 }
 0x2d0   : > { %p1175_p7 = pnand %p1174_p4, %p1310_p5 }
 0x2d1   : > { %p1180_p11 = por %p1179_p10, %p1178_p9 }
 0x2d2   : > { %p1176_p8 = pneg %p1175_p7 }
 0x2d3   : > { %p1182_p13 = por %p1181_p12, %p1180_p11 }
 0x2d5   : > { %p1183_p0 = pnand %p1182_p13, %p1176_p8 }
 0x2d7   : > { %1186 = shalt.err (!%p1183_p0)
}
 0x2d8   : > { %1117 = dma.vmem_to_hbm [thread:$0]  (%p1310_p5), %s1435_s18, 16, %s1433_s21, %s862_s22  }
 0x2d9 PF: > { %p1123_p1 = scmp.ge.s32.totalorder %s1221_s30, 2  ;;  %s886_s20 = sand.u32 1, %s1209_s27  }
 0x2da   : > { %s887_s23 = scalar_lea.sflag [#allocation3], %s886_s20 }
 0x2db   : > { %p1120_p2 = pnand %p1123_p1, %p1314_p6 }
 0x2dd   : > { %1204 = dma.done.wait (!%p1120_p2), %s887_s23, 16  }
 0x2de   : > { %1206 = vsyncadd (!%p1120_p2), %s887_s23, 4294967280  ;;  %p18_p3 = scmp.ge.s32.totalorder %s1297_s11, 4   ;;  %s1486_s27 = smov %s1213_s28 }
 0x2df   : > { %s1487_s28 = smov %s1217_s29  ;;  %s1488_s29 = smov %s1308_s14 }
 0x2e0   : > { %s1489_s30 = smov %s1297_s11  ;;  %20 = sbr.rel (!%p18_p3) target bundleno = 3 (0x3), region = 89 }
 0x2e7   :  { %891 = vsyncpa [#allocation3], 1 }
 0x2e8   :  { %893 = vsyncpa [#allocation3 + $0x1], 1 }

</bundles_post_ra>
